<compile_context>
chip_gen: v7x
topology: tpu7x:2x2x1
jax: 0.10.0
libtpu: 0.0.40
codegen_flags: <defaults>
</compile_context>

<pallas_src>
import jax
import jax.numpy as jnp
from jax.experimental import pallas as pl
from jax.experimental.pallas import tpu as pltpu


# --------------------------- block-size selection --------------------------- #
_VMEM_BLOCK_BUDGET = 12 * 1024 * 1024   # conservative: fits v5e's 16 MiB default


def _choose_row_block(vocab, n_embd, itemsize, n_streams):
    """Rows per block so all double-buffered in+out blocks fit the VMEM budget."""
    per_row = n_embd * itemsize * n_streams * 2          # x2: double buffering
    if vocab * per_row <= _VMEM_BLOCK_BUDGET:
        return vocab                                      # full-extent block (always legal)
    rows = (_VMEM_BLOCK_BUDGET // per_row) // 8 * 8       # (8, .)-aligned partial tiles
    return max(8, min(rows, vocab))


# ------------------- identity (arange-position) lookup --------------------- #
def _identity_copy_kernel(*refs):
    # refs = (in_0..in_{n-1}, out_0..out_{n-1}); pure dense block copy.
    n = len(refs) // 2
    for i in range(n):
        refs[n + i][...] = refs[i][...]


def identity_lookup(*tables):
    """Embedding lookup at positions arange(0, vocab) == tiled block copy.

    Every table stack has shape (L, vocab, n_embd); returns a tuple of arrays
    of identical shapes (== tables[i][:, arange(vocab), :]).
    """
    L, vocab, n_embd = tables[0].shape
    dtype = tables[0].dtype
    itemsize = jnp.dtype(dtype).itemsize
    n = len(tables)

    rows = _choose_row_block(vocab, n_embd, itemsize, n_streams=2 * n)
    spec = pl.BlockSpec((None, rows, n_embd), lambda l, r: (l, r, 0))
    bytes_accessed = 2 * sum(int(t.size) * itemsize for t in tables)  # read + write

    out = pl.pallas_call(
        _identity_copy_kernel,
        out_shape=tuple(jax.ShapeDtypeStruct(t.shape, t.dtype) for t in tables),
        grid_spec=pltpu.PrefetchScalarGridSpec(
            num_scalar_prefetch=0,
            grid=(L, pl.cdiv(vocab, rows)),
            in_specs=[spec] * n,
            out_specs=tuple([spec] * n),
        ),
        compiler_params=pltpu.CompilerParams(
            dimension_semantics=("parallel", "parallel")),
        cost_estimate=pl.CostEstimate(
            flops=0, transcendentals=0, bytes_accessed=bytes_accessed),
    )(*tables)
    if not isinstance(out, (tuple, list)):
        out = (out,)
    return tuple(out)


# ---------------------- general (arbitrary-position) gather ----------------- #
def _gather_row_kernel(pos_ref, table_ref, out_ref):
    # Positions are consumed by the index_maps (DMA-driven gather); the body
    # is a pure copy of the one fetched row — zero TensorCore work.
    del pos_ref
    out_ref[...] = table_ref[...]


def embedding_lookup(tables, positions):
    """tables[:, positions, :] via DMA-driven row gather.

    tables:    (T, vocab, n_embd)
    positions: (seq,) integer
    """
    T, vocab, n_embd = tables.shape
    seq = positions.shape[0]
    itemsize = jnp.dtype(tables.dtype).itemsize
    # VMEM refs have no runtime bounds check: clamp so a bad index can never
    # read adjacent / stale memory.
    positions = jnp.clip(positions.astype(jnp.int32), 0, vocab - 1)

    grid_spec = pltpu.PrefetchScalarGridSpec(
        num_scalar_prefetch=1,                     # positions -> SMEM
        grid=(T, seq),
        in_specs=[
            # Only the requested row is DMA'd from HBM per step.
            pl.BlockSpec((None, 1, n_embd), lambda t, s, pos: (t, pos[s], 0)),
        ],
        out_specs=pl.BlockSpec((None, 1, n_embd), lambda t, s, pos: (t, s, 0)),
    )
    return pl.pallas_call(
        _gather_row_kernel,
        out_shape=jax.ShapeDtypeStruct((T, seq, n_embd), tables.dtype),
        grid_spec=grid_spec,
        compiler_params=pltpu.CompilerParams(
            dimension_semantics=("parallel", "arbitrary")),
        cost_estimate=pl.CostEstimate(
            flops=0, transcendentals=0,
            bytes_accessed=2 * T * seq * n_embd * itemsize + 4 * seq),
    )(positions, tables)


# ------------------------------ module wrapper ------------------------------ #
class BiasParams:
    """Mirrors Bias.__init__: zero-initialized per-layer embedding tables."""

    def __init__(self, *, num_layers, n_embd, max_source_length, max_target_length):
        self.match_n_layer = num_layers
        self.n_embd = n_embd
        self.max_src_len = max_source_length + 2
        self.max_tgt_len = max_target_length + 2
        # nn.init.constant_(embed.weight, 0.0) for every table (f32 like torch).
        # TODO(synk): store tables as bf16 on v5e to halve bandwidth-bound copy time.
        self.encoder_attn_bias = jnp.zeros(
            (num_layers, self.max_src_len, n_embd), jnp.float32)
        self.decoder_self_attn_bias = jnp.zeros(
            (num_layers, self.max_tgt_len, n_embd), jnp.float32)
        self.decoder_cross_attn_bias = jnp.zeros(
            (num_layers, self.max_tgt_len, n_embd), jnp.float32)


def bias_forward(params, bsz, nsamples=1):
    """Mirrors Bias.forward(bsz, nsamples); the lookups don't depend on bsz.

    positions == arange(0, max_len), so every embedding lookup is an identity
    gather -> dense block copy.  Encoder layers go through one fused call;
    both decoder groups share a second fused call (no concatenate).
    """
    p = params
    (enc,) = identity_lookup(p.encoder_attn_bias)                   # (L, src, D)
    dec_self, dec_cross = identity_lookup(                          # (L, tgt, D) x2
        p.decoder_self_attn_bias, p.decoder_cross_attn_bias)

    result = []
    for ii in range(p.match_n_layer):
        result.append({
            "encoder": enc[ii],
            "self": dec_self[ii],
            "encoder_decoder": dec_cross[ii],
        })
    # NOTE: the original PyTorch forward ends with a bare `return` (None); the
    # constructed per-layer dicts are the evident intent, so we return them.
    return result


# ----------------------------------- main ----------------------------------- #
if __name__ == "__main__":
    key = jax.random.PRNGKey(0)

    # Small config consistent with the module:
    num_layers, n_embd = 2, 32
    max_source_length, max_target_length = 16, 8
    params = BiasParams(
        num_layers=num_layers,
        n_embd=n_embd,
        max_source_length=max_source_length,
        max_target_length=max_target_length,
    )

    result = bias_forward(params, bsz=2, nsamples=1)
    result = jax.block_until_ready(result)

    # Structural / semantic checks: embedding(arange) over zero tables == zeros.
    assert len(result) == num_layers
    for d in result:
        assert d["encoder"].shape == (max_source_length + 2, n_embd)
        assert d["self"].shape == (max_target_length + 2, n_embd)
        assert d["encoder_decoder"].shape == (max_target_length + 2, n_embd)
        assert bool(jnp.all(d["encoder"] == 0.0))
        assert bool(jnp.all(d["self"] == 0.0))
        assert bool(jnp.all(d["encoder_decoder"] == 0.0))

    # Kernel correctness with non-trivial tables (zero tables would hide bugs).
    T, vocab, seq = 3, max_source_length + 2, max_target_length + 2
    k1, k2 = jax.random.split(key)
    tables = jax.random.normal(k1, (T, vocab, n_embd), dtype=jnp.float32)
    pos = jax.random.randint(k2, (seq,), 0, vocab, dtype=jnp.int32)

    # 1) general DMA-driven gather vs reference
    got = jax.block_until_ready(embedding_lookup(tables, pos))
    ref = jnp.take(tables, pos, axis=1)
    assert bool(jnp.array_equal(got, ref))

    # 2) identity (arange) path == the tables themselves
    (got_id,) = identity_lookup(tables)
    got_id = jax.block_until_ready(got_id)
    assert bool(jnp.array_equal(got_id, tables))

    # 3) fused two-stack identity path (decoder self + cross pattern)
    t2 = jax.random.normal(jax.random.PRNGKey(2), (T, vocab, n_embd), jnp.float32)
    a, b = identity_lookup(tables, t2)
    jax.block_until_ready((a, b))
    assert bool(jnp.array_equal(a, tables)) and bool(jnp.array_equal(b, t2))

    print("KERNEL_OK")
</pallas_src>

<mosaic_0001>
module attributes {stable_mosaic.version = 11 : i64} {
  func.func @_identity_copy_kernel(%arg0: i32, %arg1: i32, %arg2: memref<1x18x32xf32, #tpu.memory_space<vmem>>, %arg3: memref<1x18x32xf32, #tpu.memory_space<vmem>>) attributes {dimension_semantics = [#tpu.dimension_semantics<parallel>, #tpu.dimension_semantics<parallel>], iteration_bounds = array<i64: 2, 1>, scalar_prefetch = 0 : i64, scratch_operands = 0 : i64, tpu.core_type = #tpu.core_type<tc>, window_params = [{transform_indices = @transform_0, window_bounds = array<i64: 1, 18, 32>}, {transform_indices = @transform_1, window_bounds = array<i64: 1, 18, 32>}]} {
    %c0 = arith.constant 0 : index
    %c0_0 = arith.constant 0 : index
    %c0_1 = arith.constant 0 : index
    %0 = vector.load %arg2[%c0, %c0_0, %c0_1] : memref<1x18x32xf32, #tpu.memory_space<vmem>>, vector<1x18x32xf32>
    %1 = vector.shape_cast %0 : vector<1x18x32xf32> to vector<18x32xf32>
    %c0_2 = arith.constant 0 : index
    %c0_3 = arith.constant 0 : index
    %c0_4 = arith.constant 0 : index
    %2 = vector.load %arg3[%c0_2, %c0_3, %c0_4] : memref<1x18x32xf32, #tpu.memory_space<vmem>>, vector<1x18x32xf32>
    %3 = vector.shape_cast %2 : vector<1x18x32xf32> to vector<18x32xf32>
    %4 = vector.shape_cast %1 : vector<18x32xf32> to vector<1x18x32xf32>
    tpu.vector_store %arg3[%c0_2, %c0_3, %c0_4], %4 {strides = array<i32>} : memref<1x18x32xf32, #tpu.memory_space<vmem>>, vector<1x18x32xf32>,
    return
  }
  func.func @transform_0(%arg0: i32, %arg1: i32) -> (i32, i32, i32) {
    %c0_i32 = arith.constant 0 : i32
    %c0_i32_0 = arith.constant 0 : i32
    return %arg0, %arg1, %c0_i32 : i32, i32, i32
  }
  func.func @transform_1(%arg0: i32, %arg1: i32) -> (i32, i32, i32) {
    %c0_i32 = arith.constant 0 : i32
    %c0_i32_0 = arith.constant 0 : i32
    return %arg0, %arg1, %c0_i32 : i32, i32, i32
  }
}

</mosaic_0001>

<bundles_post_ra>
// kernel: tpu_custom_call.1
= control target key start
LH: loop header
LB: loop body
LE: loop exit
PB: predicated region body
PF: predicated region fallthrough
CT: control target
= control target key end

     0   :  { %s319_s6 = smov 0   ;;  %s321_s7 = smov 0   ;;  %s340_s0 = inlined_call_operand.vmem [shape: f32[2,18,32], index: 0, kind: input, shape index: {}]   ;;  %s341_s1 = inlined_call_operand.vmem [shape: f32[2,18,32], index: 1, kind: output, shape index: {}]  }
   0x1   :  { %s323_s8 = smov 0  }
   0x2 LB: > { %s23_s9 = sadd.s32 1, %s303_s7  ;;  %p255_p0 = scmp.ge.s32.totalorder %s307_s8, 1  ;;  %s307_s8 = sphi %s323_s8, %s11_s8   ;;  %s303_s7 = sphi %s321_s7, %s343_s7   ;;  %s299_s6 = sphi %s319_s6, %s342_s6  }
   0x3   : > { %p25_p1 = scmp.ge.s32.totalorder %s23_s9, 2  ;;  %p108_p2 = scmp.lt.s32.totalorder %s307_s8, 3 }
   0x5   : > { %s345_s9 = smov (%p25_p1, %s23_s9), 0  ;;  %p109_p3 = pnand %p255_p0, %p108_p2 }
   0x6   : > { %p137_p4 = scmp.lt.s32.totalorder (!%p109_p3), %s299_s6, 1  ;;  %vm159_vm0 = vcmask (!%p109_p3), 261120   ;;  %vm162_vm1 = vcmask (!%p109_p3), 254976  }
   0x7   : > { %112 = sbr.rel (%p109_p3) target bundleno = 21 (0x15), region = 24 }
   0xe   : > { %s347_s6 = smov (!%p137_p4, %s299_s6), 1 }
   0xf   : > { %s260_s10 = smul.u32 24, %s347_s6 }
  0x11   : > { %s144_s13 = scalar_lea.vmem %s340_s0, %s260_s10  ;;  %s154_s16 = scalar_lea.vmem %s341_s1, %s260_s10 }
  0x12   : > { %v156_v0 = vld [vmem:[%s144_s13] sm:$0xff]  ;;  %v157_v1 = vld [vmem:[%s144_s13 + $0x8] sm:$0xff]  ;;  %v158_v2 = vld [vmem:[%s144_s13 + $0x10] sm:$0x3] }
  0x13   : > { %160 = vst.msk [vmem:[%s154_s16] sm:$0xff] %vm159_vm0, %v156_v0  ;;  %161 = vst.msk [vmem:[%s154_s16 + $0x8] sm:$0xff] %vm159_vm0, %v157_v1 }
  0x14   : > { %163 = vst.msk [vmem:[%s154_s16 + $0x10] sm:$0x3] %vm162_vm1, %v158_v2 }
  0x15 PF: > { %s11_s8 = sadd.s32 1, %s307_s8   ;;  %s342_s6 = smov %s303_s7 }
  0x16   : > { %p8_p5 = scmp.ge.s32.totalorder %s11_s8, 4   ;;  %s343_s7 = smov %s345_s9 }
  0x18   :  { %10 = sbr.rel (!%p8_p5) target bundleno = 2 (0x2), region = 54 }

</bundles_post_ra>
